<compile_context>
chip_gen: v6e
topology: v6e:2x2x1
jax: 0.10.0
libtpu: 0.0.40
codegen_flags: <defaults>
</compile_context>

<pallas_src>
import functools

import jax
import jax.numpy as jnp
from jax.experimental import pallas as pl
from jax.experimental.pallas import tpu as pltpu


# ----------------------------- kernel -------------------------------------- #

def _squeeze_excite_kernel(inv_hw, C, Cr, x_ref, w_ref, o_ref):
    """x_ref/o_ref: (B, C, HWp) tiles; w_ref: (2C+1, Cr+1) packed params.

    Packed layout:
      w[0:C,   0:Cr] = conv_reduce.weight.T   (C,  Cr)
      w[C:2C,  0:Cr] = conv_expand.weight     (C,  Cr)
      w[C:2C,  Cr  ] = conv_expand.bias       (C,)
      w[2C,    0:Cr] = conv_reduce.bias       (Cr,)
    """
    B, _, HWp = x_ref.shape
    n_chunks = HWp // 128

    # ---- squeeze: global average pool.  VPU partial adds over lane-aligned
    #      128-wide chunks read straight from the ref (low vreg pressure),
    #      then one cross-lane reduce per row.  Unrolled: n_chunks is small. ----
    acc = x_ref[:, :, 0:128].astype(jnp.float32)                 # (B, C, 128)
    for j in range(1, n_chunks):
        acc = acc + x_ref[:, :, j * 128:(j + 1) * 128].astype(jnp.float32)
    pooled = jnp.sum(acc, axis=2, keepdims=True) * inv_hw        # (B, C, 1)

    # ---- tiny squeeze MLP (two 1x1 convs) on the VPU/XLU — no MXU needed ----
    w = w_ref[...].astype(jnp.float32)                           # (2C+1, Cr+1)
    wrT = w[0:C, 0:Cr]                                           # (C, Cr)
    we = w[C:2 * C, 0:Cr]                                        # (C, Cr)
    be = w[C:2 * C, Cr:Cr + 1]                                   # (C, 1)
    br = w[2 * C:2 * C + 1, 0:Cr]                                # (1, Cr)

    # conv_reduce: r[b, j] = sum_c W_r[j, c] * pooled[b, c] + b_r[j]
    r = jnp.sum(wrT[None] * pooled, axis=1, keepdims=True) + br[None]   # (B,1,Cr)
    r = jnp.maximum(r, 0.0)                                      # ReLU
    # conv_expand: e[b, c] = sum_j W_e[c, j] * r[b, j] + b_e[c]
    e = jnp.sum(we[None] * r, axis=2, keepdims=True) + be[None]         # (B,C,1)

    # hard_sigmoid gate
    gate = jnp.clip(e + 3.0, 0.0, 6.0) * (1.0 / 6.0)             # (B, C, 1)

    # ---- excite: second streaming read of x, scale, unmasked 128-lane store ----
    o_ref[...] = (x_ref[...].astype(jnp.float32) * gate).astype(o_ref.dtype)


# ----------------------------- wrapper -------------------------------------- #

def prepare_params(params):
    """One-time packing of all SqueezeExcite parameters into a single array.

    Call once (outside the training/inference step); do NOT call per forward —
    the whole point is that no transpose/concat/cast XLA ops run per step.
    """
    w_reduce = jnp.asarray(params["w_reduce"], jnp.float32)      # (Cr, C)
    b_reduce = jnp.asarray(params["b_reduce"], jnp.float32)      # (Cr,)
    w_expand = jnp.asarray(params["w_expand"], jnp.float32)      # (C, Cr)
    b_expand = jnp.asarray(params["b_expand"], jnp.float32)      # (C,)
    Cr, C = w_reduce.shape
    packed = jnp.zeros((2 * C + 1, Cr + 1), jnp.float32)
    packed = packed.at[0:C, 0:Cr].set(w_reduce.T)
    packed = packed.at[C:2 * C, 0:Cr].set(w_expand)
    packed = packed.at[C:2 * C, Cr].set(b_expand)
    packed = packed.at[2 * C, 0:Cr].set(b_reduce)
    return packed


def _pick_batch_block(N, C, HWp, itemsize):
    """Images per grid step.

    Live VMEM ~= 2 double-buffers x (in + out) ~= 4x block, so cap the block at
    ~6 MiB to stay well inside v7x's 32 MiB default scoped VMEM (64 MiB
    physical); v5e/v6e (128 MiB) have even more headroom.  Keep grid >= 2 when
    N >= 2 so both v7x TensorCores get work; on v5e/v6e the extra grid step
    costs only ~0.35us.
    """
    max_block_bytes = 6 * 1024 * 1024
    cap = max(1, max_block_bytes // (C * HWp * itemsize))
    target = max(1, (N + 1) // 2)           # grid length >= 2 when N >= 2
    b = max(1, min(cap, target, N))
    while N % b != 0:                        # keep every block full (no ragged edge)
        b -= 1
    return b


def squeeze_excite(x_nchw, w_packed):
    """x_nchw: (N, C, H, W); w_packed: output of prepare_params()."""
    N, C, H, W = x_nchw.shape
    HW = H * W
    rows, cols = w_packed.shape
    assert rows == 2 * C + 1, (rows, C)
    Cr = cols - 1

    # Lane-dense spatial axis: pad H*W up to a multiple of 128 so every
    # load/store is an unmasked full-lane op (padded zeros don't affect the
    # pooled sum because inv_hw uses the true HW; padded output lanes are
    # sliced off below).
    HWp = ((HW + 127) // 128) * 128
    x = x_nchw.reshape(N, C, HW)             # free reshape (NCHW contiguous)
    if HWp != HW:
        x = jnp.pad(x, ((0, 0), (0, 0), (0, HWp - HW)))

    B = _pick_batch_block(N, C, HWp, x.dtype.itemsize)
    kernel = functools.partial(_squeeze_excite_kernel, 1.0 / HW, C, Cr)

    out = pl.pallas_call(
        kernel,
        out_shape=jax.ShapeDtypeStruct((N, C, HWp), x_nchw.dtype),
        grid_spec=pltpu.PrefetchScalarGridSpec(
            num_scalar_prefetch=0,
            grid=(N // B,),
            in_specs=[
                pl.BlockSpec((B, C, HWp), lambda n: (n, 0, 0)),
                pl.BlockSpec(w_packed.shape, lambda n: (0, 0)),
            ],
            out_specs=pl.BlockSpec((B, C, HWp), lambda n: (n, 0, 0)),
        ),
        compiler_params=pltpu.CompilerParams(
            dimension_semantics=("parallel",)),
    )(x, w_packed)

    if HWp != HW:
        out = out[:, :, :HW]
    return out.reshape(N, C, H, W)


# ----------------------------- params / reference --------------------------- #

def _make_divisible(v, divisor, min_value=None):
    if min_value is None:
        min_value = divisor
    new_v = max(min_value, int(v + divisor / 2) // divisor * divisor)
    if new_v < 0.9 * v:
        new_v += divisor
    return new_v


def make_params(key, in_chs, se_ratio=0.25, divisor=4):
    reduced = _make_divisible(in_chs * se_ratio, divisor)
    k1, k2, k3, k4 = jax.random.split(key, 4)
    p = {
        "w_reduce": jax.random.normal(k1, (reduced, in_chs), jnp.float32) * 0.1,
        "b_reduce": jax.random.normal(k2, (reduced,), jnp.float32) * 0.1,
        "w_expand": jax.random.normal(k3, (in_chs, reduced), jnp.float32) * 0.1,
        "b_expand": jax.random.normal(k4, (in_chs,), jnp.float32) * 0.1,
    }
    return p, reduced


def ref_forward(x, p):
    """Pure-JAX reference of SqueezeExcite.forward (NCHW)."""
    pooled = jnp.mean(x, axis=(2, 3), keepdims=True)                       # (N,C,1,1)
    r = jnp.einsum("nchw,dc->ndhw", pooled, p["w_reduce"]) \
        + p["b_reduce"][None, :, None, None]
    r = jnp.maximum(r, 0.0)
    e = jnp.einsum("ndhw,cd->nchw", r, p["w_expand"]) \
        + p["b_expand"][None, :, None, None]
    gate = jnp.clip(e + 3.0, 0.0, 6.0) / 6.0                               # hard_sigmoid
    return x * gate


# ----------------------------- main ----------------------------------------- #

if __name__ == "__main__":
    key = jax.random.PRNGKey(0)
    kx, kp, kx2, kp2 = jax.random.split(key, 4)

    # Test 1: lane-aligned spatial size (H*W = 256), N=2 -> grid=(2,), B=1.
    N, C, H, W = 2, 32, 16, 16          # reduced_chs = _make_divisible(32*0.25, 4) = 8
    x = jax.random.normal(kx, (N, C, H, W), jnp.float32)
    params, _ = make_params(kp, C)
    w_packed = prepare_params(params)   # one-time parameter packing (hoisted)

    out = jax.block_until_ready(squeeze_excite(x, w_packed))
    ref = ref_forward(x, params)
    assert out.shape == (N, C, H, W), out.shape
    err = float(jnp.max(jnp.abs(out - ref)))
    assert jnp.allclose(out, ref, atol=1e-4, rtol=1e-4), err

    # Test 2: non-128-multiple spatial size (14x14=196 -> padded to 256) and
    # batched blocks (N=4 -> B=2, grid=(2,)).
    N2, C2, H2, W2 = 4, 16, 14, 14      # reduced_chs = 4
    x2 = jax.random.normal(kx2, (N2, C2, H2, W2), jnp.float32)
    params2, _ = make_params(kp2, C2)
    w_packed2 = prepare_params(params2)

    out2 = jax.block_until_ready(squeeze_excite(x2, w_packed2))
    ref2 = ref_forward(x2, params2)
    err2 = float(jnp.max(jnp.abs(out2 - ref2)))
    assert jnp.allclose(out2, ref2, atol=1e-4, rtol=1e-4), err2

    print("KERNEL_OK")
</pallas_src>

<mosaic_0001>
module attributes {stable_mosaic.version = 11 : i64} {
  func.func @_squeeze_excite_kernel(%arg0: i32, %arg1: memref<1x32x256xf32, #tpu.memory_space<vmem>>, %arg2: memref<65x9xf32, #tpu.memory_space<vmem>>, %arg3: memref<1x32x256xf32, #tpu.memory_space<vmem>>) attributes {dimension_semantics = [#tpu.dimension_semantics<parallel>], iteration_bounds = array<i64: 2>, scalar_prefetch = 0 : i64, scratch_operands = 0 : i64, tpu.core_type = #tpu.core_type<tc>, window_params = [{transform_indices = @transform_0, window_bounds = array<i64: 1, 32, 256>}, {pipeline_mode = #tpu.pipeline_mode<synchronous>, transform_indices = @transform_1, window_bounds = array<i64: 65, 9>}, {transform_indices = @transform_2, window_bounds = array<i64: 1, 32, 256>}]} {
    %c0 = arith.constant 0 : index
    %c0_0 = arith.constant 0 : index
    %c0_1 = arith.constant 0 : index
    %0 = vector.load %arg1[%c0, %c0_0, %c0_1] : memref<1x32x256xf32, #tpu.memory_space<vmem>>, vector<1x32x128xf32>
    %c0_2 = arith.constant 0 : index
    %c0_3 = arith.constant 0 : index
    %c128 = arith.constant 128 : index
    %1 = vector.load %arg1[%c0_2, %c0_3, %c128] : memref<1x32x256xf32, #tpu.memory_space<vmem>>, vector<1x32x128xf32>
    %2 = arith.addf %0, %1 : vector<1x32x128xf32>
    %cst = arith.constant dense<0.000000e+00> : vector<1x32xf32>
    %3 = vector.multi_reduction <add>, %2, %cst [2] : vector<1x32x128xf32> to vector<1x32xf32>
    %4 = vector.shape_cast %3 : vector<1x32xf32> to vector<1x32x1xf32>
    %cst_4 = arith.constant 3.906250e-03 : f32
    %5 = vector.broadcast %cst_4 : f32 to vector<1x32x1xf32>
    %6 = arith.mulf %4, %5 : vector<1x32x1xf32>
    %c0_5 = arith.constant 0 : index
    %c0_6 = arith.constant 0 : index
    %7 = vector.load %arg2[%c0_5, %c0_6] : memref<65x9xf32, #tpu.memory_space<vmem>>, vector<65x9xf32>
    %8 = vector.extract_strided_slice %7 {offsets = [0, 0], sizes = [32, 8], strides = [1, 1]} : vector<65x9xf32> to vector<32x8xf32>
    %9 = vector.extract_strided_slice %7 {offsets = [32, 0], sizes = [32, 8], strides = [1, 1]} : vector<65x9xf32> to vector<32x8xf32>
    %10 = vector.extract_strided_slice %7 {offsets = [32, 8], sizes = [32, 1], strides = [1, 1]} : vector<65x9xf32> to vector<32x1xf32>
    %11 = vector.extract_strided_slice %7 {offsets = [64, 0], sizes = [1, 8], strides = [1, 1]} : vector<65x9xf32> to vector<1x8xf32>
    %12 = vector.shape_cast %8 : vector<32x8xf32> to vector<1x32x8xf32>
    %13 = vector.broadcast %6 : vector<1x32x1xf32> to vector<1x32x8xf32>
    %14 = arith.mulf %12, %13 : vector<1x32x8xf32>
    %cst_7 = arith.constant dense<0.000000e+00> : vector<1x8xf32>
    %15 = vector.multi_reduction <add>, %14, %cst_7 [1] : vector<1x32x8xf32> to vector<1x8xf32>
    %16 = vector.shape_cast %15 : vector<1x8xf32> to vector<1x1x8xf32>
    %17 = vector.shape_cast %11 : vector<1x8xf32> to vector<1x1x8xf32>
    %18 = arith.addf %16, %17 : vector<1x1x8xf32>
    %cst_8 = arith.constant 0.000000e+00 : f32
    %19 = vector.broadcast %cst_8 : f32 to vector<1x1x8xf32>
    %20 = arith.maximumf %18, %19 : vector<1x1x8xf32>
    %21 = vector.shape_cast %9 : vector<32x8xf32> to vector<1x32x8xf32>
    %22 = vector.broadcast %20 : vector<1x1x8xf32> to vector<1x32x8xf32>
    %23 = arith.mulf %21, %22 : vector<1x32x8xf32>
    %cst_9 = arith.constant dense<0.000000e+00> : vector<1x32xf32>
    %24 = vector.multi_reduction <add>, %23, %cst_9 [2] : vector<1x32x8xf32> to vector<1x32xf32>
    %25 = vector.shape_cast %24 : vector<1x32xf32> to vector<1x32x1xf32>
    %26 = vector.shape_cast %10 : vector<32x1xf32> to vector<1x32x1xf32>
    %27 = arith.addf %25, %26 : vector<1x32x1xf32>
    %cst_10 = arith.constant 3.000000e+00 : f32
    %28 = vector.broadcast %cst_10 : f32 to vector<1x32x1xf32>
    %29 = arith.addf %27, %28 : vector<1x32x1xf32>
    %cst_11 = arith.constant 0.000000e+00 : f32
    %cst_12 = arith.constant 6.000000e+00 : f32
    %30 = vector.broadcast %cst_11 : f32 to vector<1x32x1xf32>
    %31 = arith.maximumf %30, %29 : vector<1x32x1xf32>
    %32 = vector.broadcast %cst_12 : f32 to vector<1x32x1xf32>
    %33 = arith.minimumf %32, %31 : vector<1x32x1xf32>
    %cst_13 = arith.constant 0.166666672 : f32
    %34 = vector.broadcast %cst_13 : f32 to vector<1x32x1xf32>
    %35 = arith.mulf %33, %34 : vector<1x32x1xf32>
    %c0_14 = arith.constant 0 : index
    %c0_15 = arith.constant 0 : index
    %c0_16 = arith.constant 0 : index
    %36 = vector.load %arg1[%c0_14, %c0_15, %c0_16] : memref<1x32x256xf32, #tpu.memory_space<vmem>>, vector<1x32x256xf32>
    %37 = vector.broadcast %35 : vector<1x32x1xf32> to vector<1x32x256xf32>
    %38 = arith.mulf %36, %37 : vector<1x32x256xf32>
    %c0_17 = arith.constant 0 : index
    %c0_18 = arith.constant 0 : index
    %c0_19 = arith.constant 0 : index
    %39 = vector.load %arg3[%c0_17, %c0_18, %c0_19] : memref<1x32x256xf32, #tpu.memory_space<vmem>>, vector<1x32x256xf32>
    tpu.vector_store %arg3[%c0_17, %c0_18, %c0_19], %38 {strides = array<i32>} : memref<1x32x256xf32, #tpu.memory_space<vmem>>, vector<1x32x256xf32>,
    return
  }
  func.func @transform_0(%arg0: i32) -> (i32, i32, i32) {
    %c0_i32 = arith.constant 0 : i32
    %c0_i32_0 = arith.constant 0 : i32
    %c0_i32_1 = arith.constant 0 : i32
    return %arg0, %c0_i32, %c0_i32_0 : i32, i32, i32
  }
  func.func @transform_1(%arg0: i32) -> (i32, i32) {
    %c0_i32 = arith.constant 0 : i32
    %c0_i32_0 = arith.constant 0 : i32
    %c0_i32_1 = arith.constant 0 : i32
    return %c0_i32, %c0_i32_0 : i32, i32
  }
  func.func @transform_2(%arg0: i32) -> (i32, i32, i32) {
    %c0_i32 = arith.constant 0 : i32
    %c0_i32_0 = arith.constant 0 : i32
    %c0_i32_1 = arith.constant 0 : i32
    return %arg0, %c0_i32, %c0_i32_0 : i32, i32, i32
  }
}

</mosaic_0001>

<bundles_post_ra>
// kernel: tpu_custom_call.1
= control target key start
LH: loop header
LB: loop body
LE: loop exit
PB: predicated region body
PF: predicated region fallthrough
CT: control target
= control target key end

     0   :  { %7 = vsyncpa [#allocation3], 0  ;;  %s792_s0 = inlined_call_operand.hbm [shape: f32[2,32,256], index: 0, kind: input, shape index: {}]   ;;  %s793_s1 = inlined_call_operand.vmem [shape: f32[65,9], index: 1, kind: input, shape index: {}]   ;;  %s794_s2 = inlined_call_operand.hbm [shape: f32[2,32,256], index: 2, kind: output, shape index: {}]  }
   0x1   :  { %9 = vsyncpa [#allocation3 + $0x1], 0 }
   0x2   :  { %10 = vsyncpa [#allocation4], 0 }
   0x3   :  { %12 = vsyncpa [#allocation4 + $0x1], 0  ;;  %s567_s9 = smov 0   ;;  %s569_s10 = smov 0  }
   0x4   :  { %s571_s11 = smov 0   ;;  %s573_s12 = smov 0  }
   0x5 LB: > { %s588_s13 = sadd.s32 4294967295, %s543_s12   ;;  %s382_s14 = sadd.s32 4294967294, %s543_s12   ;;  %s543_s12 = sphi %s573_s12, %s809_s12   ;;  %s539_s11 = sphi %s571_s11, %s808_s11   ;;  %s535_s10 = sphi %s569_s10, %s807_s10   ;;  %s531_s9 = sphi %s567_s9, %s806_s9  }
   0x6   : > { %s592_s15 = sadd.s32 1, %s543_s12   ;;  %s25_s16 = sadd.s32 1, %s539_s11 }
   0x7   : > { %s22_s17 = ssub.s32 %s543_s12, %s592_s15  ;;  %p32_p0 = scmp.ne.s32.totalorder %s539_s11, %s535_s10 }
   0x8   : > { %p23_p1 = scmp.eq.s32.totalorder %s22_s17, 0  ;;  %p33_p2 = scmp.eq.s32.totalorder %s543_s12, 0 }
   0x9   : > { %p38_p3 = scmp.ne.s32.totalorder %s535_s10, %s531_s9  ;;  %p39_p4 = scmp.eq.s32.totalorder %s588_s13, 0 }
   0xa   : > { %s604_s18 = scalar_select %p23_p1, %s539_s11, %s25_s16  }
   0xb   : > { %p606_p5 = por %p33_p2, %p32_p0  ;;  %p610_p6 = por %p39_p4, %p38_p3 }
   0xc   : > { %p83_p7 = scmp.eq.s32.totalorder %s588_s13, 1  ;;  %p89_p8 = scmp.eq.s32.totalorder %s382_s14, 1 }
   0xd   : > { %s798_s20 = scalar_select %p610_p6, 1, 0 }
   0xe   : > { %p410_p10 = scmp.lt.s32.totalorder %s543_s12, 2  ;;  %p617_p11 = por %p83_p7, %p32_p0 }
   0xf   : > { %p621_p12 = por %p89_p8, %p38_p3  ;;  %s112_s23 = sand.u32 1, %s539_s11  }
  0x10   : > { %s799_s21 = scalar_select %p617_p11, 1, 0 }
  0x11   : > { %s800_s22 = scalar_select %p621_p12, 1, 0 }
  0x12   : > { %s396_s24 = sshll.u32 %s543_s12, 10  ;;  %s385_s25 = sshll.u32 %s112_s23, 6 }
  0x13   : > { %s630_s28 = scalar_lea.hbm %s792_s0, %s396_s24  ;;  %s116_s29 = scalar_lea.vmem [#allocation2], %s385_s25 }
  0x14   : > { %s123_s30 = sshll.u32 %s116_s29, 4  ;;  %p634_p13 = pnand %p410_p10, %p606_p5  ;;  %s638_s30 = int_to_ptr.vmem [resolvable:$true] %s123_s30 }
  0x15   : > { %s640_s4 = scalar_lea.sflag [#allocation3], %s112_s23  ;;  %s451_s5 = scalar_lea.hbm %s630_s28, 1024 }
  0x16   : > { %p452_p0 = scmp.ne.s32.totalorder %s630_s28, %s451_s5  ;;  %p453_p1 = pneg %p634_p13 }
  0x17   : > { %s456_s8 = scalar_lea.hbm %s792_s0, 2048  ;;  %p457_p4 = scmp.lt.s32.totalorder %s630_s28, %s792_s0 }
  0x18   : > { %p454_p2 = pnand %p453_p1, %p452_p0  ;;  %p458_p5 = scmp.lt.s32.totalorder %s456_s8, %s451_s5 }
  0x1a   : > { %p455_p3 = pneg %p454_p2  ;;  %p459_p7 = por %p458_p5, %p457_p4 }
  0x1c   : > { %p460_p8 = pnand %p459_p7, %p455_p3 }
  0x1e   : > { %463 = shalt.err (!%p460_p8)
}
  0x1f   : > { %s464_s17 = scalar_lea.vmem %s638_s30, 1024  ;;  %s545_s19 = smov [#allocation2]  }
  0x20   : > { %p465_p10 = scmp.ne.s32.totalorder %s638_s30, %s464_s17  ;;  %s469_s23 = sshll.u32 %s545_s19, 4  ;;  %s470_s23 = int_to_ptr.vmem [resolvable:$false] %s469_s23 }
  0x21   : > { %s471_s24 = scalar_lea.vmem %s470_s23, 2048  ;;  %p472_p2 = scmp.lt.s32.totalorder %s638_s30, %s470_s23 }
  0x22   : > { %p467_p9 = pnand %p465_p10, %p453_p1  ;;  %p473_p12 = scmp.lt.s32.totalorder %s471_s24, %s464_s17 }
  0x24   : > { %p468_p0 = pneg %p467_p9  ;;  %p474_p11 = por %p473_p12, %p472_p2 }
  0x26   : > { %p475_p6 = pnand %p474_p11, %p468_p0 }
  0x28   : > { %478 = shalt.err (!%p475_p6)
}
  0x29   : > { %s546_s25 = smov 256   ;;  %s547_s26 = smov 16  }
  0x2a   : > { %405 = dma.hbm_to_vmem [thread:$0]  (!%p634_p13), %s630_s28, 1024, %s638_s30, %s640_s4, %s546_s25, %s546_s25, %s547_s26  }
  0x2b   : > { %p388_p9 = scmp.ge.s32.totalorder %s543_s12, 1  ;;  %p131_p1 = scmp.lt.s32.totalorder %s543_s12, 3 }
  0x2d   : > { %p132_p3 = pnand %p388_p9, %p131_p1 }
  0x2e   : > { %s664_s27 = sand.u32 (!%p132_p3), 1, %s535_s10   ;;  %p802_p6 = scmp.ne.s32.totalorder (!%p132_p3), %s798_s20, 0 }
  0x2f   : > { %135 = sbr.rel (%p132_p3) target bundleno = 526 (0x20e), region = 28  ;;  %s389_s29 = sshll.u32 (!%p132_p3), %s664_s27, 6 }
  0x30   : > { %s138_s5 = scalar_lea.sflag (!%p132_p3), [#allocation3], %s664_s27  ;;  %s141_s6 = scalar_lea.vmem (!%p132_p3), [#allocation2], %s389_s29 }
  0x34   : > { %522 = dma.done.wait (%p802_p6), %s138_s5, 1024  }
  0x35   : > { %524 = vsyncadd (%p802_p6), %s138_s5, 4294966272  ;;  %v674_v0 = vld [vmem:[%s141_s6] sm:$0xff]  ;;  %v676_v1 = vld [vmem:[%s141_s6 + $0x8] sm:$0xff]  ;;  %vm199_vm0 = vcmask 64512   ;;  %v215_v38 = vlaneseq  ;;  %v548_v60 = vmov 8   ;;  %s161_s28 = scalar_lea.vmem [#allocation5], %s389_s29 }
  0x36   : > { %v678_v2 = vld [vmem:[%s141_s6 + $0x20] sm:$0xff]  ;;  %v170_v3 = vadd.f32 %v676_v1, %v674_v0  ;;  %v682_v4 = vld [vmem:[%s141_s6 + $0x28] sm:$0xff]  ;;  %v684_v5 = vld [vmem:[%s141_s6 + $0x10] sm:$0xff]  ;;  %450 = vset.pattern.permute.xlu1 %v548_v60  ;;  %449 = vset.pattern.permute.xlu0 %v548_v60  ;;  %s309_s30 = sshll.u32 %s161_s28, 4  ;;  %s397_s3 = sshll.u32 %s588_s13, 10  ;;  %s742_s30 = int_to_ptr.vmem [resolvable:$true] %s309_s30 }
  0x37   : > { %v686_v6 = vld [vmem:[%s141_s6 + $0x18] sm:$0xff]  ;;  %v172_v7 = vadd.f32 %v682_v4, %v678_v2  ;;  %v690_v8 = vld [vmem:[%s141_s6 + $0x30] sm:$0xff]  ;;  %v186_v15 = vld [vmem:[%s793_s1] sm:$0xff]  ;;  %v216_v41 = vshrl.u32 %v215_v38, 7  ;;  %s747_s7 = scalar_lea.hbm %s794_s2, %s397_s3  ;;  %s296_s13 = scalar_lea.sflag [#allocation4], %s664_s27 }
  0x38   : > { %v692_v9 = vld [vmem:[%s141_s6 + $0x38] sm:$0xff]  ;;  %174 = vadd.xlane.f32.xlu0 %v170_v3  ;;  %v171_v10 = vadd.f32 %v686_v6, %v684_v5  ;;  %v188_v17 = vld [vmem:[%s793_s1 + $0x10] sm:$0xff]  ;;  %v187_v18 = vld [vmem:[%s793_s1 + $0x8] sm:$0xff]  ;;  %s479_s8 = scalar_lea.vmem %s742_s30, 1024  ;;  %p803_p12 = scmp.ne.s32.totalorder %s799_s21, 0 }
  0x39   : > { %178 = vadd.xlane.f32.xlu1 %v172_v7  ;;  %v173_v11 = vadd.f32 %v692_v9, %v690_v8  ;;  %v189_v22 = vld [vmem:[%s793_s1 + $0x18] sm:$0xff]  ;;  %v194_v42 = vld [vmem:[%s793_s1 + $0x40] sm:$0x1]  ;;  %v217_v45 = vsub.s32 0, %v216_v41  ;;  %v191_v47 = vld [vmem:[%s793_s1 + $0x28] sm:$0xff]  ;;  %p480_p11 = scmp.ne.s32.totalorder %s742_s30, %s479_s8  ;;  %s549_s14 = smov [#allocation5]  }
  0x3a   : > { %v190_v48 = vld [vmem:[%s793_s1 + $0x20] sm:$0xff]  ;;  %v193_v50 = vld [vmem:[%s793_s1 + $0x38] sm:$0xff]  ;;  %v192_v51 = vld [vmem:[%s793_s1 + $0x30] sm:$0xff]  ;;  %s483_s16 = sshll.u32 %s549_s14, 4  ;;  %s484_s16 = int_to_ptr.vmem [resolvable:$false] %s483_s16 }
  0x3b   : > { %p481_p13 = pnand %p480_p11, %p803_p12  ;;  %s485_s17 = scalar_lea.vmem %s484_s16, 2048 }
  0x3c   : > { %176 = vadd.xlane.f32.xlu0 %v171_v10  ;;  %p486_p5 = scmp.lt.s32.totalorder %s742_s30, %s484_s16  ;;  %p487_p7 = scmp.lt.s32.totalorder %s485_s17, %s479_s8 }
  0x3d   : > { %180 = vadd.xlane.f32.xlu1 %v173_v11  ;;  %p482_p4 = pneg %p481_p13 }
  0x3e   : > { %p488_p8 = por %p487_p7, %p486_p5 }
  0x40   : > { %p489_p10 = pnand %p488_p8, %p482_p4 }
  0xc1   : > { %v175_v12 = vpop.xlane.xlu0 %174 }
  0xc2   : > { %v182_v13 = vmul.f32 0.00390625, %v175_v12  ;;  %v179_v14 = vpop.xlane.xlu1 %178 }
  0xc3   : > { %v184_v16 = vmul.f32 0.00390625, %v179_v14 }
  0xc4   : > { %v195_v20 = vmul.f32 %v186_v15, %v182_v13 }
  0xc5   : > { %v177_v19 = vpop.xlane.xlu0 %176  ;;  %v197_v25 = vmul.f32 %v188_v17, %v184_v16 }
  0xc6   : > { %v183_v21 = vmul.f32 0.00390625, %v177_v19  ;;  %v181_v23 = vpop.xlane.xlu1 %180  ;;  %v200_v28 = vsel %vm199_vm0, %v195_v20, 0.0 }
  0xc7   : > { %v185_v24 = vmul.f32 0.00390625, %v181_v23  ;;  %v203_v31 = vsel %vm199_vm0, %v197_v25, 0.0 }
  0xc8   : > { %v196_v26 = vmul.f32 %v187_v18, %v183_v21 }
  0xc9   : > { %v198_v27 = vmul.f32 %v189_v22, %v185_v24 }
  0xca   : > { %v201_v29 = vsel %vm199_vm0, %v196_v26, 0.0 }
  0xcb   : > { %v202_v30 = vadd.f32 %v201_v29, %v200_v28  ;;  %v205_v32 = vsel %vm199_vm0, %v198_v27, 0.0 }
  0xcd   : > { %v204_v33 = vadd.f32 %v203_v31, %v202_v30 }
  0xcf   : > { %v206_v34 = vadd.f32 %v205_v32, %v204_v33 }
  0xd1   : > { %v207_v35 = vrot.slane %v206_v34, 4 }
  0xd3   : > { %v208_v36 = vadd.f32 %v207_v35, %v206_v34 }
  0xd5   : > { %v209_v37 = vrot.slane %v208_v36, 2 }
  0xd7   : > { %v210_v39 = vadd.f32 %v209_v37, %v208_v36 }
  0xd9   : > { %v211_v40 = vrot.slane %v210_v39, 1 }
  0xdb   : > { %v212_v43 = vadd.f32 %v211_v40, %v210_v39 }
  0xdd   : > { %v213_v44 = vadd.f32 %v212_v43, %v194_v42 }
  0xdf   : > { %v214_v46 = vmax.f32 %v213_v44, 0.0 }
  0xe1   : > { %v218_v49 = vrot.slane %v214_v46, %v217_v45 }
  0xe3   : > { %v220_v52 = vmul.f32 %v218_v49, %v191_v47  ;;  %v219_v53 = vmul.f32 %v218_v49, %v190_v48  ;;  %v222_v56 = vmul.f32 %v218_v49, %v193_v50  ;;  %v221_v57 = vmul.f32 %v218_v49, %v192_v51 }
  0xe5   : > { %v226_v54 = vsel %vm199_vm0, %v220_v52, 0.0  ;;  %v223_v55 = vsel %vm199_vm0, %v219_v53, 0.0  ;;  %v232_v58 = vsel %vm199_vm0, %v222_v56, 0.0  ;;  %v229_v59 = vsel %vm199_vm0, %v221_v57, 0.0 }
  0xe6   : > { %227 = vadd.xlane.f32.xlu1 %v226_v54  ;;  %224 = vadd.xlane.f32.xlu0 %v223_v55 }
  0xea   : > { %233 = vadd.xlane.f32.xlu1 %v232_v58  ;;  %230 = vadd.xlane.f32.xlu0 %v229_v59 }
 0x16f   : > { %v228_v61 = vpop.xlane.xlu1 %227  ;;  %v225_v62 = vpop.xlane.xlu0 %224 }
 0x170   : > { %v236_v63 = vadd.f32 %v228_v61, %v191_v47  ;;  %v235_v3 = vadd.f32 %v225_v62, %v190_v48 }
 0x172   : > { %v240_v7 = vadd.f32 3.0, %v236_v63  ;;  %v239_v10 = vadd.f32 3.0, %v235_v3 }
 0x173   : > { %v234_v11 = vpop.xlane.xlu1 %233  ;;  %v231_v12 = vpop.xlane.xlu0 %230 }
 0x174   : > { %v244_v13 = vmax.f32 %v240_v7, 0.0  ;;  %v243_v14 = vmax.f32 %v239_v10, 0.0  ;;  %v238_v15 = vadd.f32 %v234_v11, %v193_v50  ;;  %v237_v16 = vadd.f32 %v231_v12, %v192_v51 }
 0x176   : > { %v248_v17 = vmin.f32 %v244_v13, 6.0  ;;  %v247_v18 = vmin.f32 %v243_v14, 6.0  ;;  %v242_v19 = vadd.f32 3.0, %v238_v15  ;;  %v241_v20 = vadd.f32 3.0, %v237_v16 }
 0x178   : > { %v252_v21 = vmul.f32 0.16666667, %v248_v17  ;;  %v251_v22 = vmul.f32 0.16666667, %v247_v18  ;;  %v246_v23 = vmax.f32 %v242_v19, 0.0  ;;  %v245_v24 = vmax.f32 %v241_v20, 0.0 }
 0x17a   : > { %v249_v25 = vmin.f32 %v245_v24, 6.0  ;;  %266 = vperm.xlu1 %450, %v252_v21   ;;  %261 = vperm.xlu0 %449, %v251_v22   ;;  %v250_v26 = vmin.f32 %v246_v23, 6.0 }
 0x17c   : > { %v253_v27 = vmul.f32 0.16666667, %v249_v25  ;;  %v254_v28 = vmul.f32 0.16666667, %v250_v26 }
 0x17e   : > { %271 = vperm.xlu1 %450, %v253_v27  }
 0x182   : > { %276 = vperm.xlu1 %450, %v254_v28  }
 0x1f5   : > { %v267_v29 = vpop.permute.xlu1 %266  ;;  %v262_v30 = vpop.permute.xlu0 %261 }
 0x1f6   : > { %v281_v31 = vmul.f32 %v267_v29, %v684_v5  ;;  %v282_v32 = vmul.f32 %v267_v29, %v686_v6  ;;  %v279_v33 = vmul.f32 %v262_v30, %v674_v0  ;;  %v280_v34 = vmul.f32 %v262_v30, %v676_v1 }
 0x1f8   : > { %289 = vst [vmem:[%s161_s28 + $0x10] sm:$0xff] %v281_v31  ;;  %290 = vst [vmem:[%s161_s28 + $0x18] sm:$0xff] %v282_v32 }
 0x1f9   : > { %287 = vst [vmem:[%s161_s28] sm:$0xff] %v279_v33  ;;  %288 = vst [vmem:[%s161_s28 + $0x8] sm:$0xff] %v280_v34  ;;  %v272_v35 = vpop.permute.xlu1 %271 }
 0x1fa   : > { %v283_v36 = vmul.f32 %v272_v35, %v678_v2  ;;  %v284_v5 = vmul.f32 %v272_v35, %v682_v4 }
 0x1fc   : > { %291 = vst [vmem:[%s161_s28 + $0x20] sm:$0xff] %v283_v36  ;;  %292 = vst [vmem:[%s161_s28 + $0x28] sm:$0xff] %v284_v5 }
 0x1fd   : > { %v277_v0 = vpop.permute.xlu1 %276 }
 0x1fe   : > { %v285_v1 = vmul.f32 %v277_v0, %v690_v8  ;;  %v286_v2 = vmul.f32 %v277_v0, %v692_v9 }
 0x200   : > { %293 = vst [vmem:[%s161_s28 + $0x30] sm:$0xff] %v285_v1  ;;  %294 = vst [vmem:[%s161_s28 + $0x38] sm:$0xff] %v286_v2 }
 0x201   : > { %492 = shalt.err (!%p489_p10)
}
 0x202   : > { %s493_s19 = scalar_lea.hbm %s747_s7, 1024  ;;  %s497_s25 = scalar_lea.hbm %s794_s2, 2048 }
 0x203   : > { %p494_p0 = scmp.ne.s32.totalorder %s747_s7, %s493_s19  ;;  %p498_p1 = scmp.lt.s32.totalorder %s747_s7, %s794_s2 }
 0x204   : > { %p499_p3 = scmp.lt.s32.totalorder %s497_s25, %s493_s19 }
 0x205   : > { %p495_p2 = pnand %p494_p0, %p803_p12 }
 0x206   : > { %p500_p6 = por %p499_p3, %p498_p1 }
 0x207   : > { %p496_p9 = pneg %p495_p2 }
 0x209   : > { %p501_p11 = pnand %p500_p6, %p496_p9 }
 0x20b   : > { %504 = shalt.err (!%p501_p11)
}
 0x20c   : > { %s550_s6 = smov 256   ;;  %s551_s20 = smov 16  }
 0x20d   : > { %400 = dma.vmem_to_hbm [thread:$0]  (%p803_p12), %s742_s30, 1024, %s747_s7, %s296_s13, %s550_s6, %s550_s6, %s551_s20  }
 0x20e PF: > { %s324_s28 = sand.u32 1, %s531_s9   ;;  %p804_p13 = scmp.ne.s32.totalorder %s800_s22, 0 }
 0x20f   : > { %p805_p4 = scmp.ge.s32.totalorder %s543_s12, 2  ;;  %s325_s3 = scalar_lea.sflag [#allocation4], %s324_s28 }
 0x211   : > { %p407_p5 = pnand %p805_p4, %p804_p13 }
 0x213   : > { %p408_p7 = pneg %p407_p5 }
 0x215   : > { %526 = dma.done.wait (%p408_p7), %s325_s3, 1024  }
 0x216   : > { %528 = vsyncadd (%p408_p7), %s325_s3, 4294966272  ;;  %p15_p8 = scmp.ge.s32.totalorder %s592_s15, 4   ;;  %s806_s9 = smov %s535_s10 }
 0x217   : > { %s807_s10 = smov %s539_s11  ;;  %s808_s11 = smov %s604_s18 }
 0x218   : > { %s809_s12 = smov %s592_s15  ;;  %17 = sbr.rel (!%p15_p8) target bundleno = 5 (0x5), region = 73 }
 0x21d   :  { %330 = vsyncpa [#allocation3], 1 }
 0x21e   :  { %332 = vsyncpa [#allocation3 + $0x1], 1 }
 0x21f   :  { %333 = vsyncpa [#allocation4], 1 }
 0x220   :  { %335 = vsyncpa [#allocation4 + $0x1], 1 }

</bundles_post_ra>
